<compile_context>
chip_gen: v7x
topology: tpu7x:2x2x1
jax: 0.10.0
libtpu: 0.0.40
codegen_flags: <defaults>
</compile_context>

<pallas_src>
import jax
import jax.numpy as jnp
from jax import lax
from jax.experimental import pallas as pl
from jax.experimental.pallas import tpu as pltpu

# ---- physical constants (mirroring the PyTorch script) ----
GAMMA = 10.0
KBT = 0.05
DT_COEF = KBT / GAMMA
SIGMA = 1.0
DR = 3.0 * DT_COEF / SIGMA
D_DIM = 2
GAMMA_R = (D_DIM - 1) * DR
SPRING_CONSTANT = 1.0

LANES = 128

# Rows (of 128 lanes) per grid step.  4096 rows * 128 lanes * 4 B = 2 MiB per
# buffer; with double-buffered input + output tiles that is 8 MiB of VMEM --
# comfortably under v5e's 16 MiB default scoped limit and v7x's 64 MiB
# physical VMEM -- while each step moves ~4 MiB of HBM traffic, enough to hide
# the per-grid-step overhead on all generations (incl. v7x at 3.2 TB/s).
R_TILE_MAX = 4096

# Below this many particles the pallas_call fixed dispatch overhead dwarfs the
# 32 B/particle of work; let XLA fuse the elementwise math instead.  The
# Pallas path no longer carries any relayout cost, so break-even is small.
_PALLAS_MIN_NPTL = 256


def _round_up(x, m):
    return ((x + m - 1) // m) * m


def _cdiv(a, b):
    return -(-a // b)


def _ode_force_kernel(x_ref, o_ref, *, c, gamma_r):
    # x_ref / o_ref: (tile_rows, 128) f32 blocks; every 4 consecutive lanes
    # hold one particle as [rx, ry, vx, vy].
    x = x_ref[...]
    # Lane roll by +2 positions (shift = 128-2 under jnp.roll semantics):
    # puts vx over the rx lane and vy over the ry lane.  The two lanes that
    # wrap around per row land only on lane%4 >= 2 positions, which the mask
    # below discards.  XLU op -> off the DMA-bound critical path.
    v_over_r = pltpu.roll(x, LANES - 2, 1)
    lane = lax.broadcasted_iota(jnp.int32, x.shape, 1) & 3
    f_r = v_over_r - c * x            # valid where lane%4 < 2 (position lanes)
    f_v = (-gamma_r) * x              # valid where lane%4 >= 2 (velocity lanes)
    o_ref[...] = jnp.where(lane < 2, f_r, f_v)   # single unmasked full store


def ode_force(X, spring_constant=SPRING_CONSTANT, friction=(GAMMA, GAMMA_R)):
    """Pallas equivalent of ODE.forward(spring_constant, Friction, X)."""
    # NOTE: constants are folded at trace time; if spring_constant / friction
    # ever become traced JAX values, pass them through SMEM scalars instead.
    gamma = float(friction[0])
    gamma_r = float(friction[1])
    c = float(spring_constant) / gamma

    nptl, feat = X.shape
    assert feat == 4, "X must have 4 columns: [rx, ry, vx, vy]"

    if nptl < _PALLAS_MIN_NPTL:
        # Tiny problem: a standalone kernel can never beat the XLA-fused op.
        # TODO(synk): fuse the force evaluation into the surrounding
        # integrator kernel's tile loop instead of a standalone pallas_call.
        return ode_force_ref(X, spring_constant, friction)

    total = nptl * 4                       # flat element count (multiple of 4)
    rows = _cdiv(total, LANES)             # 32 particles per 128-lane row
    padded_total = rows * LANES

    x_flat = X.reshape(-1)                 # free row-major view, no relayout
    if padded_total != total:
        # Only the tail of the last 128-lane row is padded; every particle's
        # 4 components stay contiguous, so the in-kernel roll never mixes
        # padding into valid lanes.  (Extra HBM pass only when nptl % 32 != 0.)
        x_flat = jnp.pad(x_flat, (0, padded_total - total))
    x2d = x_flat.reshape(rows, LANES)

    # Row tile: large payload per step, >= 2 grid steps when there is enough
    # work (v7x megacore), last block may be partial (Pallas masks OOB writes;
    # OOB reads feed only discarded elementwise results).
    if rows <= 8:
        tile = rows                        # equals full dim -> valid block
    else:
        tile = min(R_TILE_MAX, _round_up(_cdiv(rows, 2), 8))
    grid = _cdiv(rows, tile)

    kernel = lambda x_ref, o_ref: _ode_force_kernel(
        x_ref, o_ref, c=c, gamma_r=gamma_r)

    out2d = pl.pallas_call(
        kernel,
        out_shape=jax.ShapeDtypeStruct((rows, LANES), X.dtype),
        grid_spec=pltpu.PrefetchScalarGridSpec(
            num_scalar_prefetch=0,
            grid=(grid,),
            in_specs=[pl.BlockSpec((tile, LANES), lambda i: (i, 0))],
            out_specs=pl.BlockSpec((tile, LANES), lambda i: (i, 0)),
        ),
        compiler_params=pltpu.CompilerParams(
            # Independent particle tiles: lets v7x split the grid across both
            # TensorCores; harmless on v5e/v6e.
            dimension_semantics=("parallel",)),
    )(x2d)

    out_flat = out2d.reshape(-1)
    if padded_total != total:
        out_flat = out_flat[:total]
    return out_flat.reshape(nptl, 4)


def ode_force_ref(X, spring_constant=SPRING_CONSTANT, friction=(GAMMA, GAMMA_R)):
    gamma, gamma_r = friction
    r = X[:, :2]
    v = X[:, 2:]
    f_r = v - spring_constant / gamma * r
    f_v = -gamma_r * v
    return jnp.concatenate([f_r, f_v], axis=-1)


if __name__ == "__main__":
    key = jax.random.PRNGKey(0)
    k0, k1, k2, k3 = jax.random.split(key, 4)

    # Main test: multi-step grid through the Pallas path (rows=128, 2 tiles).
    nptl = 4096
    X = jax.random.normal(k0, (nptl, 4), dtype=jnp.float32)
    out = jax.block_until_ready(ode_force(X))
    ref = ode_force_ref(X)
    assert out.shape == (nptl, 4)
    assert jnp.allclose(out, ref, atol=1e-6, rtol=1e-6), "mismatch vs reference"

    # Partial-last-block path: rows=125 does not divide the 64-row tile.
    nptl_p = 4000
    Xp = jax.random.normal(k1, (nptl_p, 4), dtype=jnp.float32)
    outp = jax.block_until_ready(ode_force(Xp))
    assert outp.shape == (nptl_p, 4)
    assert jnp.allclose(outp, ode_force_ref(Xp), atol=1e-6, rtol=1e-6)

    # Non-multiple-of-32 particle count: exercises the flat-pad tail path.
    nptl2 = 1000
    X2 = jax.random.normal(k2, (nptl2, 4), dtype=jnp.float32)
    out2 = jax.block_until_ready(ode_force(X2))
    assert out2.shape == (nptl2, 4)
    assert jnp.allclose(out2, ode_force_ref(X2), atol=1e-6, rtol=1e-6)

    # Tiny particle count: dispatches to the fused pure-JAX path.
    nptl3 = 8
    X3 = jax.random.normal(k3, (nptl3, 4), dtype=jnp.float32)
    out3 = jax.block_until_ready(ode_force(X3))
    assert jnp.allclose(out3, ode_force_ref(X3), atol=1e-6, rtol=1e-6)

    print("KERNEL_OK")
</pallas_src>

<mosaic_0001>
module attributes {stable_mosaic.version = 11 : i64} {
  func.func @_lambda_(%arg0: i32, %arg1: memref<64x128xf32, #tpu.memory_space<vmem>>, %arg2: memref<64x128xf32, #tpu.memory_space<vmem>>) attributes {dimension_semantics = [#tpu.dimension_semantics<parallel>], iteration_bounds = array<i64: 2>, scalar_prefetch = 0 : i64, scratch_operands = 0 : i64, tpu.core_type = #tpu.core_type<tc>, window_params = [{transform_indices = @transform_0, window_bounds = array<i64: 64, 128>}, {transform_indices = @transform_1, window_bounds = array<i64: 64, 128>}]} {
    %c0 = arith.constant 0 : index
    %c0_0 = arith.constant 0 : index
    %0 = vector.load %arg1[%c0, %c0_0] : memref<64x128xf32, #tpu.memory_space<vmem>>, vector<64x128xf32>
    %c126_i32 = arith.constant 126 : i32
    %1 = tpu.dynamic_rotate %0 by %c126_i32 dim 1 : vector<64x128xf32>, i32 -> vector<64x128xf32>
    %2 = tpu.iota {dimensions = array<i32: 1>} : vector<64x128xi32>
    %c3_i32 = arith.constant 3 : i32
    %3 = vector.broadcast %c3_i32 : i32 to vector<64x128xi32>
    %4 = arith.andi %2, %3 : vector<64x128xi32>
    %cst = arith.constant 1.000000e-01 : f32
    %5 = vector.broadcast %cst : f32 to vector<64x128xf32>
    %6 = arith.mulf %5, %0 : vector<64x128xf32>
    %7 = arith.subf %1, %6 : vector<64x128xf32>
    %cst_1 = arith.constant -1.500000e-02 : f32
    %8 = vector.broadcast %cst_1 : f32 to vector<64x128xf32>
    %9 = arith.mulf %8, %0 : vector<64x128xf32>
    %c2_i32 = arith.constant 2 : i32
    %10 = vector.broadcast %c2_i32 : i32 to vector<64x128xi32>
    %11 = arith.cmpi slt, %4, %10 : vector<64x128xi32>
    %12 = arith.select %11, %7, %9 : vector<64x128xi1>, vector<64x128xf32>
    %c0_2 = arith.constant 0 : index
    %c0_3 = arith.constant 0 : index
    %13 = vector.load %arg2[%c0_2, %c0_3] : memref<64x128xf32, #tpu.memory_space<vmem>>, vector<64x128xf32>
    tpu.vector_store %arg2[%c0_2, %c0_3], %12 {strides = array<i32>} : memref<64x128xf32, #tpu.memory_space<vmem>>, vector<64x128xf32>,
    return
  }
  func.func @transform_0(%arg0: i32) -> (i32, i32) {
    %c0_i32 = arith.constant 0 : i32
    %c0_i32_0 = arith.constant 0 : i32
    return %arg0, %c0_i32 : i32, i32
  }
  func.func @transform_1(%arg0: i32) -> (i32, i32) {
    %c0_i32 = arith.constant 0 : i32
    %c0_i32_0 = arith.constant 0 : i32
    return %arg0, %c0_i32 : i32, i32
  }
}

</mosaic_0001>

<bundles_post_ra>
// kernel: tpu_custom_call.1
= control target key start
LH: loop header
LB: loop body
LE: loop exit
PB: predicated region body
PF: predicated region fallthrough
CT: control target
= control target key end

     0   :  { %6 = vsyncpa [#allocation3], 0  ;;  %s671_s0 = inlined_call_operand.hbm [shape: f32[128,128], index: 0, kind: input, shape index: {}]   ;;  %s672_s1 = inlined_call_operand.hbm [shape: f32[128,128], index: 1, kind: output, shape index: {}]  }
   0x1   :  { %8 = vsyncpa [#allocation3 + $0x1], 0 }
   0x2   :  { %9 = vsyncpa [#allocation4], 0 }
   0x3   :  { %11 = vsyncpa [#allocation4 + $0x1], 0  ;;  %s474_s6 = smov 0   ;;  %s476_s7 = smov 0  }
   0x4   :  { %s478_s8 = smov 0   ;;  %s480_s9 = smov 0  }
   0x5 LB: > { %s495_s10 = sadd.s32 4294967295, %s455_s9   ;;  %s292_s11 = sadd.s32 4294967294, %s455_s9   ;;  %s455_s9 = sphi %s480_s9, %s687_s9   ;;  %s451_s8 = sphi %s478_s8, %s686_s8   ;;  %s447_s7 = sphi %s476_s7, %s685_s7   ;;  %s443_s6 = sphi %s474_s6, %s684_s6  }
   0x6   : > { %s499_s12 = sadd.s32 1, %s455_s9   ;;  %s24_s13 = sadd.s32 1, %s451_s8 }
   0x7   : > { %s21_s14 = ssub.s32 %s455_s9, %s499_s12  ;;  %p31_p0 = scmp.ne.s32.totalorder %s451_s8, %s447_s7 }
   0x8   : > { %p22_p1 = scmp.eq.s32.totalorder %s21_s14, 0  ;;  %p32_p2 = scmp.eq.s32.totalorder %s455_s9, 0 }
   0x9   : > { %p37_p3 = scmp.ne.s32.totalorder %s447_s7, %s443_s6  ;;  %p38_p4 = scmp.eq.s32.totalorder %s495_s10, 0 }
   0xa   : > { %s511_s15 = scalar_select %p22_p1, %s451_s8, %s24_s13  }
   0xb   : > { %p513_p5 = por %p32_p2, %p31_p0  ;;  %p517_p6 = por %p38_p4, %p37_p3 }
   0xc   : > { %p61_p7 = scmp.eq.s32.totalorder %s495_s10, 1  ;;  %p67_p8 = scmp.eq.s32.totalorder %s292_s11, 1 }
   0xd   : > { %p320_p10 = scmp.lt.s32.totalorder %s455_s9, 2  ;;  %s87_s20 = sand.u32 1, %s451_s8  }
   0xe   : > { %p524_p11 = por %p61_p7, %p31_p0  ;;  %p528_p12 = por %p67_p8, %p37_p3 }
   0xf   : > { %s306_s21 = sshll.u32 %s455_s9, 10  ;;  %s295_s22 = sshll.u32 %s87_s20, 6 }
  0x10   : > { %s676_s18 = scalar_select %p524_p11, 1, 0 }
  0x11   : > { %s677_s19 = scalar_select %p528_p12, 1, 0 }
  0x12   : > { %s537_s25 = scalar_lea.hbm %s671_s0, %s306_s21  ;;  %s91_s26 = scalar_lea.vmem [#allocation2], %s295_s22 }
  0x13   : > { %s98_s27 = sshll.u32 %s91_s26, 4  ;;  %p541_p13 = pnand %p320_p10, %p513_p5  ;;  %s545_s27 = int_to_ptr.vmem [resolvable:$true] %s98_s27 }
  0x14   : > { %s547_s29 = scalar_lea.sflag [#allocation3], %s87_s20  ;;  %s359_s30 = scalar_lea.hbm %s537_s25, 1024 }
  0x15   : > { %p360_p0 = scmp.ne.s32.totalorder %s537_s25, %s359_s30  ;;  %p361_p1 = pneg %p541_p13 }
  0x16   : > { %s364_s4 = scalar_lea.hbm %s671_s0, 2048  ;;  %p365_p4 = scmp.lt.u32.totalorder %s537_s25, %s671_s0 }
  0x17   : > { %p362_p2 = pnand %p361_p1, %p360_p0  ;;  %p366_p5 = scmp.lt.u32.totalorder %s364_s4, %s359_s30 }
  0x18   : > { %p368_p8 = scmp.lt.u32.totalorder %s359_s30, %s537_s25 }
  0x19   : > { %p363_p3 = pneg %p362_p2  ;;  %p367_p7 = por %p366_p5, %p365_p4 }
  0x1b   : > { %p369_p10 = por %p368_p8, %p367_p7 }
  0x1d   : > { %p370_p9 = pnand %p369_p10, %p363_p3 }
  0x1f   : > { %373 = shalt.err (!%p370_p9)
}
  0x20   : > { %s374_s13 = scalar_lea.vmem %s545_s27, 1024  ;;  %s457_s14 = smov [#allocation2]  }
  0x21   : > { %p375_p0 = scmp.ne.s32.totalorder %s545_s27, %s374_s13  ;;  %s379_s16 = sshll.u32 %s457_s14, 4  ;;  %s380_s16 = int_to_ptr.vmem [resolvable:$false] %s379_s16 }
  0x22   : > { %s381_s20 = scalar_lea.vmem %s380_s16, 2048  ;;  %p382_p11 = scmp.lt.s32.totalorder %s545_s27, %s380_s16 }
  0x23   : > { %p377_p2 = pnand %p375_p0, %p361_p1  ;;  %p383_p4 = scmp.lt.s32.totalorder %s381_s20, %s374_s13 }
  0x25   : > { %p378_p12 = pneg %p377_p2  ;;  %p384_p5 = por %p383_p4, %p382_p11 }
  0x27   : > { %p385_p7 = pnand %p384_p5, %p378_p12 }
  0x29   : > { %388 = shalt.err (!%p385_p7)
}
  0x2a   : > { %s458_s21 = smov 128   ;;  %s459_s22 = smov 8  }
  0x2b   : > { %315 = dma.hbm_to_vmem [thread:$0]  (!%p541_p13), %s537_s25, 1024, %s545_s27, %s547_s29, %s458_s21, %s458_s21, %s459_s22  }
  0x2c   : > { %p298_p9 = scmp.ge.s32.totalorder %s455_s9, 1  ;;  %p106_p1 = scmp.lt.s32.totalorder %s455_s9, 3 }
  0x2e   : > { %p107_p3 = pnand %p298_p9, %p106_p1 }
  0x2f   : > { %s578_s23 = sand.u32 (!%p107_p3), 1, %s447_s7  }
  0x30   : > { %110 = sbr.rel (%p107_p3) target bundleno = 202 (0xca), region = 24  ;;  %s299_s24 = sshll.u32 (!%p107_p3), %s578_s23, 6 }
  0x31   : > { %s113_s26 = scalar_lea.sflag (!%p107_p3), [#allocation3], %s578_s23  ;;  %s116_s30 = scalar_lea.vmem (!%p107_p3), [#allocation2], %s299_s24 }
  0x37   : > { %434 = dma.done.wait (%p517_p6), %s113_s26, 1024  }
  0x38   : > { %436 = vsyncadd (%p517_p6), %s113_s26, 4294966272  ;;  %v139_v0 = vld [vmem:[%s116_s30 + $0x10] sm:$0xff]  ;;  %v137_v1 = vld [vmem:[%s116_s30] sm:$0xff]  ;;  %s460_s25 = smov 126   ;;  %v161_v8 = vlaneseq  ;;  %s598_s17 = scalar_lea.vmem [#allocation5], %s299_s24 }
  0x39   : > { %149 = vrot.lane.b32.xlu1 %v139_v0, %s460_s25  ;;  %145 = vrot.lane.b32.xlu0 %v137_v1, %s460_s25  ;;  %v140_v2 = vld [vmem:[%s116_s30 + $0x18] sm:$0xff]  ;;  %v138_v3 = vld [vmem:[%s116_s30 + $0x8] sm:$0xff]  ;;  %v166_v11 = vmul.f32 0.1, %v139_v0  ;;  %v164_v12 = vmul.f32 0.1, %v137_v1 }
  0x3a   : > { %v142_v4 = vld [vmem:[%s116_s30 + $0x28] sm:$0xff]  ;;  %v141_v5 = vld [vmem:[%s116_s30 + $0x20] sm:$0xff]  ;;  %v144_v6 = vld [vmem:[%s116_s30 + $0x38] sm:$0xff]  ;;  %v162_v9 = vand.u32 127, %v161_v8  ;;  %v182_v13 = vmul.f32 -0.015, %v139_v0 }
  0x3b   : > { %v143_v7 = vld [vmem:[%s116_s30 + $0x30] sm:$0xff]  ;;  %v180_v14 = vmul.f32 -0.015, %v137_v1  ;;  %v167_v20 = vmul.f32 0.1, %v140_v2  ;;  %s219_s27 = sshll.u32 %s598_s17, 4  ;;  %s614_s27 = int_to_ptr.vmem [resolvable:$true] %s219_s27 }
  0x3c   : > { %v163_v10 = vand.u32 3, %v162_v9  ;;  %v165_v21 = vmul.f32 0.1, %v138_v3  ;;  %v183_v22 = vmul.f32 -0.015, %v140_v2  ;;  %s307_s28 = sshll.u32 %s495_s10, 10 }
  0x3d   : > { %151 = vrot.lane.b32.xlu1 %v140_v2, %s460_s25  ;;  %147 = vrot.lane.b32.xlu0 %v138_v3, %s460_s25  ;;  %v181_v23 = vmul.f32 -0.015, %v138_v3  ;;  %v169_v30 = vmul.f32 0.1, %v142_v4  ;;  %v168_v31 = vmul.f32 0.1, %v141_v5  ;;  %s621_s2 = scalar_lea.hbm %s672_s1, %s307_s28 }
  0x3e   : > { %vm588_vm0 = vcmp.lt.s32.totalorder %v163_v10, 2  ;;  %v185_v32 = vmul.f32 -0.015, %v142_v4  ;;  %v184_v33 = vmul.f32 -0.015, %v141_v5  ;;  %s206_s3 = scalar_lea.sflag [#allocation4], %s578_s23 }
  0x3f   : > { %v171_v40 = vmul.f32 0.1, %v144_v6  ;;  %v170_v41 = vmul.f32 0.1, %v143_v7  ;;  %v187_v42 = vmul.f32 -0.015, %v144_v6 }
  0x40   : > { %v186_v43 = vmul.f32 -0.015, %v143_v7  ;;  %s389_s4 = scalar_lea.vmem %s614_s27, 1024  ;;  %p681_p11 = scmp.ne.s32.totalorder %s676_s18, 0 }
  0x41   : > { %155 = vrot.lane.b32.xlu1 %v142_v4, %s460_s25  ;;  %153 = vrot.lane.b32.xlu0 %v141_v5, %s460_s25  ;;  %p390_p6 = scmp.ne.s32.totalorder %s614_s27, %s389_s4  ;;  %s461_s5 = smov [#allocation5]  }
  0x42   : > { %s393_s11 = sshll.u32 %s461_s5, 4  ;;  %s394_s11 = int_to_ptr.vmem [resolvable:$false] %s393_s11 }
  0x43   : > { %p391_p12 = pnand %p390_p6, %p681_p11  ;;  %s395_s13 = scalar_lea.vmem %s394_s11, 2048 }
  0x44   : > { %p396_p8 = scmp.lt.s32.totalorder %s614_s27, %s394_s11  ;;  %p397_p10 = scmp.lt.s32.totalorder %s395_s13, %s389_s4 }
  0x45   : > { %159 = vrot.lane.b32.xlu1 %v144_v6, %s460_s25  ;;  %157 = vrot.lane.b32.xlu0 %v143_v7, %s460_s25  ;;  %p392_p13 = pneg %p391_p12 }
  0x46   : > { %p398_p0 = por %p397_p10, %p396_p8 }
  0x48   : > { %p399_p2 = pnand %p398_p0, %p392_p13 }
  0xab   : > { %v150_v16 = vpop.permute.xlu1 %149  ;;  %v146_v17 = vpop.permute.xlu0 %145 }
  0xac   : > { %v174_v18 = vsub.f32 %v150_v16, %v166_v11  ;;  %v172_v19 = vsub.f32 %v146_v17, %v164_v12 }
  0xae   : > { %v191_v24 = vsel %vm588_vm0, %v174_v18, %v182_v13  ;;  %v189_v25 = vsel %vm588_vm0, %v172_v19, %v180_v14 }
  0xaf   : > { %199 = vst [vmem:[%s598_s17 + $0x10] sm:$0xff] %v191_v24  ;;  %197 = vst [vmem:[%s598_s17] sm:$0xff] %v189_v25  ;;  %v152_v26 = vpop.permute.xlu1 %151  ;;  %v148_v27 = vpop.permute.xlu0 %147 }
  0xb0   : > { %v175_v28 = vsub.f32 %v152_v26, %v167_v20  ;;  %v173_v29 = vsub.f32 %v148_v27, %v165_v21 }
  0xb2   : > { %v192_v34 = vsel %vm588_vm0, %v175_v28, %v183_v22  ;;  %v190_v35 = vsel %vm588_vm0, %v173_v29, %v181_v23 }
  0xb3   : > { %200 = vst [vmem:[%s598_s17 + $0x18] sm:$0xff] %v192_v34  ;;  %198 = vst [vmem:[%s598_s17 + $0x8] sm:$0xff] %v190_v35  ;;  %v156_v36 = vpop.permute.xlu1 %155  ;;  %v154_v37 = vpop.permute.xlu0 %153 }
  0xb4   : > { %v177_v38 = vsub.f32 %v156_v36, %v169_v30  ;;  %v176_v39 = vsub.f32 %v154_v37, %v168_v31 }
  0xb6   : > { %v194_v44 = vsel %vm588_vm0, %v177_v38, %v185_v32  ;;  %v193_v45 = vsel %vm588_vm0, %v176_v39, %v184_v33 }
  0xb7   : > { %202 = vst [vmem:[%s598_s17 + $0x28] sm:$0xff] %v194_v44  ;;  %201 = vst [vmem:[%s598_s17 + $0x20] sm:$0xff] %v193_v45  ;;  %v160_v46 = vpop.permute.xlu1 %159  ;;  %v158_v47 = vpop.permute.xlu0 %157 }
  0xb8   : > { %v179_v48 = vsub.f32 %v160_v46, %v171_v40  ;;  %v178_v49 = vsub.f32 %v158_v47, %v170_v41 }
  0xba   : > { %v196_v50 = vsel %vm588_vm0, %v179_v48, %v187_v42  ;;  %v195_v51 = vsel %vm588_vm0, %v178_v49, %v186_v43 }
  0xbb   : > { %204 = vst [vmem:[%s598_s17 + $0x38] sm:$0xff] %v196_v50  ;;  %203 = vst [vmem:[%s598_s17 + $0x30] sm:$0xff] %v195_v51 }
  0xbc   : > { %402 = shalt.err (!%p399_p2)
}
  0xbd   : > { %s403_s14 = scalar_lea.hbm %s621_s2, 1024  ;;  %s407_s21 = scalar_lea.hbm %s672_s1, 2048 }
  0xbe   : > { %p404_p4 = scmp.ne.s32.totalorder %s621_s2, %s403_s14  ;;  %p408_p9 = scmp.lt.u32.totalorder %s621_s2, %s672_s1 }
  0xbf   : > { %p409_p1 = scmp.lt.u32.totalorder %s407_s21, %s403_s14  ;;  %p411_p6 = scmp.lt.u32.totalorder %s403_s14, %s621_s2 }
  0xc0   : > { %p405_p5 = pnand %p404_p4, %p681_p11 }
  0xc1   : > { %p410_p3 = por %p409_p1, %p408_p9 }
  0xc2   : > { %p406_p7 = pneg %p405_p5 }
  0xc3   : > { %p412_p12 = por %p411_p6, %p410_p3 }
  0xc5   : > { %p413_p13 = pnand %p412_p12, %p406_p7 }
  0xc7   : > { %416 = shalt.err (!%p413_p13)
}
  0xc8   : > { %s462_s26 = smov 128   ;;  %s463_s30 = smov 8  }
  0xc9   : > { %310 = dma.vmem_to_hbm [thread:$0]  (%p681_p11), %s614_s27, 1024, %s621_s2, %s206_s3, %s462_s26, %s462_s26, %s463_s30  }
  0xca PF: > { %s234_s25 = sand.u32 1, %s443_s6   ;;  %p682_p8 = scmp.ne.s32.totalorder %s677_s19, 0 }
  0xcb   : > { %p683_p10 = scmp.ge.s32.totalorder %s455_s9, 2  ;;  %s235_s17 = scalar_lea.sflag [#allocation4], %s234_s25 }
  0xcd   : > { %p317_p0 = pnand %p683_p10, %p682_p8 }
  0xcf   : > { %438 = dma.done.wait (!%p317_p0), %s235_s17, 1024  }
  0xd0   : > { %440 = vsyncadd (!%p317_p0), %s235_s17, 4294966272  ;;  %p14_p2 = scmp.ge.s32.totalorder %s499_s12, 4   ;;  %s684_s6 = smov %s447_s7 }
  0xd1   : > { %s685_s7 = smov %s451_s8  ;;  %s686_s8 = smov %s511_s15 }
  0xd2   : > { %s687_s9 = smov %s499_s12  ;;  %16 = sbr.rel (!%p14_p2) target bundleno = 5 (0x5), region = 69 }
  0xd9   :  { %240 = vsyncpa [#allocation3], 1 }
  0xda   :  { %242 = vsyncpa [#allocation3 + $0x1], 1 }
  0xdb   :  { %243 = vsyncpa [#allocation4], 1 }
  0xdc   :  { %245 = vsyncpa [#allocation4 + $0x1], 1 }

</bundles_post_ra>
